<compile_context>
chip_gen: v7x
topology: tpu7x:2x2x1
jax: 0.10.0
libtpu: 0.0.40
codegen_flags: <defaults>
</compile_context>

<pallas_src>
import jax
import jax.numpy as jnp
from jax.experimental import pallas as pl
from jax.experimental.pallas import tpu as pltpu


def _leaky_relu(x, slope=0.25):
    return jnp.where(x >= 0, x, slope * x)


def rtarget_kernel(x_ref, w1_ref, w2_ref, w3_ref, o_ref):
    # x_ref : (1, in_c, TS)   channels on sublanes, spatial on lanes
    # w1    : (hid_c, in_c)   w2: (hid_c, hid_c)   w3: (out_c, hid_c)
    # o_ref : (1, out_c, TS)
    x = x_ref[0]                                              # (in_c, TS)
    h = jnp.dot(w1_ref[...], x, preferred_element_type=jnp.float32)
    h = _leaky_relu(h)
    h = jnp.dot(w2_ref[...], h, preferred_element_type=jnp.float32)
    h = _leaky_relu(h)
    o = jnp.dot(w3_ref[...], h, preferred_element_type=jnp.float32)
    o_ref[0] = o.astype(o_ref.dtype)


def _round_up(x, m):
    return ((x + m - 1) // m) * m


def _pick_tile_s(S, N, in_c, hid_c, out_c, *, max_tile_s=65536,
                 vmem_budget_bytes=12 * 1024 * 1024, min_grid_steps=4):
    """Largest lane-dense (multiple-of-128) spatial tile such that
    (a) the per-step double-buffered VMEM footprint stays under budget
        (safe for v5e's 16 MiB scoped default and v7x's 64 MiB physical),
    (b) the grid keeps >= min_grid_steps total steps when possible
        (feeds both v7x TensorCores / keeps the pipeline busy)."""
    # Per-lane f32 bytes per grid step: 2x input block + 2x output block
    # (double-buffering) + ~2 (hid_c, tile) intermediates in the body.
    bytes_per_lane = 4 * (2 * in_c + 2 * out_c + 2 * hid_c)
    cap = max(128, (vmem_budget_bytes // bytes_per_lane) // 128 * 128)
    tile = min(_round_up(max(S, 1), 128), _round_up(max_tile_s, 128), cap)
    tile = max(128, tile // 128 * 128)
    # Back off tile size if the grid would collapse to 1-2 steps.
    while tile > 128 and N * ((S + tile - 1) // tile) < min_grid_steps:
        tile = max(128, (tile // 2) // 128 * 128)
    return tile


def rtarget_net_pallas(x_ncdhw, w1, w2, w3, *, max_tile_s=65536):
    """x_ncdhw: (N, in_c, D, H, W) float32.  Returns (N, out_c, D, H, W)."""
    N, C, D, H, W = x_ncdhw.shape
    hid_c = w1.shape[0]
    out_c = w3.shape[0]
    assert w1.shape == (hid_c, C)
    assert w2.shape == (hid_c, hid_c)
    assert w3.shape == (out_c, hid_c)

    S = D * H * W
    # Free reshape: native NCDHW memory order, spatial flattened onto lanes.
    x_flat = x_ncdhw.reshape(N, C, S)

    tile_s = _pick_tile_s(S, N, C, hid_c, out_c, max_tile_s=max_tile_s)
    grid = (N, pl.cdiv(S, tile_s))           # ragged final block is fine:
                                             # per-lane MLP + masked out store

    cost = pl.CostEstimate(
        flops=2 * N * S * (hid_c * C + hid_c * hid_c + out_c * hid_c),
        transcendentals=0,
        bytes_accessed=4 * (N * S * (C + out_c)
                            + hid_c * C + hid_c * hid_c + out_c * hid_c),
    )

    out_flat = pl.pallas_call(
        rtarget_kernel,
        out_shape=jax.ShapeDtypeStruct((N, out_c, S), jnp.float32),
        grid_spec=pltpu.PrefetchScalarGridSpec(
            num_scalar_prefetch=0,
            grid=grid,
            in_specs=[
                # input tile: channels on sublanes, lane-dense spatial axis
                pl.BlockSpec((1, C, tile_s), lambda n, s: (n, 0, s)),
                # tiny weights: full-array constant-index blocks, VMEM-resident
                pl.BlockSpec((hid_c, C), lambda n, s: (0, 0)),
                pl.BlockSpec((hid_c, hid_c), lambda n, s: (0, 0)),
                pl.BlockSpec((out_c, hid_c), lambda n, s: (0, 0)),
            ],
            # lane-dense output tile (last dim multiple of 128; final block
            # may be partial -> Pallas masks the store)
            out_specs=pl.BlockSpec((1, out_c, tile_s), lambda n, s: (n, 0, s)),
        ),
        compiler_params=pltpu.CompilerParams(
            dimension_semantics=("parallel", "parallel")),
        cost_estimate=cost,
    )(x_flat, w1, w2, w3)

    # Free reshape back to NCDHW.
    return out_flat.reshape(N, out_c, D, H, W)


def reference_forward(x_ncdhw, w1, w2, w3):
    """Pure-JAX reference matching PyTorch 1x1x1-conv (no bias) semantics."""
    x = jnp.transpose(x_ncdhw, (0, 2, 3, 4, 1))               # NDHWC
    h = _leaky_relu(jnp.einsum("ndhwc,oc->ndhwo", x, w1))
    h = _leaky_relu(jnp.einsum("ndhwc,oc->ndhwo", h, w2))
    o = jnp.einsum("ndhwc,oc->ndhwo", h, w3)
    return jnp.transpose(o, (0, 4, 1, 2, 3))                   # NCDHW


def _run_case(key, N, in_c, out_c, D, H, W):
    hid_c = in_c // 2
    kx, k1, k2, k3 = jax.random.split(key, 4)
    x = jax.random.normal(kx, (N, in_c, D, H, W), dtype=jnp.float32)
    # Conv3d weights (bias=False).  The PyTorch init loop only touches
    # Conv2d/Linear, so these keep default-style random init; scaled normals.
    w1 = jax.random.normal(k1, (hid_c, in_c), jnp.float32) * (1.0 / jnp.sqrt(in_c))
    w2 = jax.random.normal(k2, (hid_c, hid_c), jnp.float32) * (1.0 / jnp.sqrt(hid_c))
    w3 = jax.random.normal(k3, (out_c, hid_c), jnp.float32) * (1.0 / jnp.sqrt(hid_c))

    out = jax.block_until_ready(rtarget_net_pallas(x, w1, w2, w3))
    ref = jax.block_until_ready(reference_forward(x, w1, w2, w3))
    assert out.shape == (N, out_c, D, H, W)
    assert jnp.max(jnp.abs(out - ref)) < 1e-4


if __name__ == "__main__":
    key = jax.random.PRNGKey(0)
    k_a, k_b = jax.random.split(key)

    # Case 1: spatial size a clean multiple of 128 (S = 4*8*16 = 512).
    _run_case(k_a, N=2, in_c=8, out_c=6, D=4, H=8, W=16)

    # Case 2: ragged spatial size (S = 3*7*11 = 231) -> exercises the partial
    # final block path (masked output store, per-lane-safe garbage input lanes).
    _run_case(k_b, N=2, in_c=8, out_c=6, D=3, H=7, W=11)

    print("KERNEL_OK")
</pallas_src>

<mosaic_0001>
module attributes {stable_mosaic.version = 11 : i64} {
  func.func @rtarget_kernel(%arg0: i32, %arg1: i32, %arg2: memref<1x8x256xf32, #tpu.memory_space<vmem>>, %arg3: memref<4x8xf32, #tpu.memory_space<vmem>>, %arg4: memref<4x4xf32, #tpu.memory_space<vmem>>, %arg5: memref<6x4xf32, #tpu.memory_space<vmem>>, %arg6: memref<1x6x256xf32, #tpu.memory_space<vmem>>) attributes {dimension_semantics = [#tpu.dimension_semantics<parallel>, #tpu.dimension_semantics<parallel>], iteration_bounds = array<i64: 2, 2>, scalar_prefetch = 0 : i64, scratch_operands = 0 : i64, tpu.core_type = #tpu.core_type<tc>, window_params = [{transform_indices = @transform_0, window_bounds = array<i64: 1, 8, 256>}, {pipeline_mode = #tpu.pipeline_mode<synchronous>, transform_indices = @transform_1, window_bounds = array<i64: 4, 8>}, {pipeline_mode = #tpu.pipeline_mode<synchronous>, transform_indices = @transform_2, window_bounds = array<i64: 4, 4>}, {pipeline_mode = #tpu.pipeline_mode<synchronous>, transform_indices = @transform_3, window_bounds = array<i64: 6, 4>}, {transform_indices = @transform_4, window_bounds = array<i64: 1, 6, 256>}]} {
    %c0 = arith.constant 0 : index
    %c0_0 = arith.constant 0 : index
    %c0_1 = arith.constant 0 : index
    %0 = vector.load %arg2[%c0, %c0_0, %c0_1] : memref<1x8x256xf32, #tpu.memory_space<vmem>>, vector<1x8x256xf32>
    %1 = vector.shape_cast %0 : vector<1x8x256xf32> to vector<8x256xf32>
    %c0_2 = arith.constant 0 : index
    %c0_3 = arith.constant 0 : index
    %2 = vector.load %arg3[%c0_2, %c0_3] : memref<4x8xf32, #tpu.memory_space<vmem>>, vector<4x8xf32>
    %cst = arith.constant dense<0.000000e+00> : vector<4x256xf32>
    %3 = tpu.matmul %2, %1, %cst {dimension_numbers = #tpu.dot_dimension_numbers<[1], [0], [0], [1], [0, 0, 1, 1], [], []>} : vector<4x8xf32>, vector<8x256xf32>, vector<4x256xf32> -> vector<4x256xf32>
    %cst_4 = arith.constant 0.000000e+00 : f32
    %4 = vector.broadcast %cst_4 : f32 to vector<4x256xf32>
    %5 = arith.cmpf oge, %3, %4 : vector<4x256xf32>
    %cst_5 = arith.constant 2.500000e-01 : f32
    %6 = vector.broadcast %cst_5 : f32 to vector<4x256xf32>
    %7 = arith.mulf %6, %3 : vector<4x256xf32>
    %8 = arith.select %5, %3, %7 : vector<4x256xi1>, vector<4x256xf32>
    %c0_6 = arith.constant 0 : index
    %c0_7 = arith.constant 0 : index
    %9 = vector.load %arg4[%c0_6, %c0_7] : memref<4x4xf32, #tpu.memory_space<vmem>>, vector<4x4xf32>
    %cst_8 = arith.constant dense<0.000000e+00> : vector<4x256xf32>
    %10 = tpu.matmul %9, %8, %cst_8 {dimension_numbers = #tpu.dot_dimension_numbers<[1], [0], [0], [1], [0, 0, 1, 1], [], []>} : vector<4x4xf32>, vector<4x256xf32>, vector<4x256xf32> -> vector<4x256xf32>
    %cst_9 = arith.constant 0.000000e+00 : f32
    %11 = vector.broadcast %cst_9 : f32 to vector<4x256xf32>
    %12 = arith.cmpf oge, %10, %11 : vector<4x256xf32>
    %cst_10 = arith.constant 2.500000e-01 : f32
    %13 = vector.broadcast %cst_10 : f32 to vector<4x256xf32>
    %14 = arith.mulf %13, %10 : vector<4x256xf32>
    %15 = arith.select %12, %10, %14 : vector<4x256xi1>, vector<4x256xf32>
    %c0_11 = arith.constant 0 : index
    %c0_12 = arith.constant 0 : index
    %16 = vector.load %arg5[%c0_11, %c0_12] : memref<6x4xf32, #tpu.memory_space<vmem>>, vector<6x4xf32>
    %cst_13 = arith.constant dense<0.000000e+00> : vector<6x256xf32>
    %17 = tpu.matmul %16, %15, %cst_13 {dimension_numbers = #tpu.dot_dimension_numbers<[1], [0], [0], [1], [0, 0, 1, 1], [], []>} : vector<6x4xf32>, vector<4x256xf32>, vector<6x256xf32> -> vector<6x256xf32>
    %c0_14 = arith.constant 0 : index
    %c0_15 = arith.constant 0 : index
    %c0_16 = arith.constant 0 : index
    %18 = vector.load %arg6[%c0_14, %c0_15, %c0_16] : memref<1x6x256xf32, #tpu.memory_space<vmem>>, vector<1x6x256xf32>
    %19 = vector.shape_cast %18 : vector<1x6x256xf32> to vector<6x256xf32>
    %20 = vector.shape_cast %17 : vector<6x256xf32> to vector<1x6x256xf32>
    tpu.vector_store %arg6[%c0_14, %c0_15, %c0_16], %20 {strides = array<i32>} : memref<1x6x256xf32, #tpu.memory_space<vmem>>, vector<1x6x256xf32>,
    return
  }
  func.func @transform_0(%arg0: i32, %arg1: i32) -> (i32, i32, i32) {
    %c0_i32 = arith.constant 0 : i32
    %c0_i32_0 = arith.constant 0 : i32
    return %arg0, %c0_i32, %arg1 : i32, i32, i32
  }
  func.func @transform_1(%arg0: i32, %arg1: i32) -> (i32, i32) {
    %c0_i32 = arith.constant 0 : i32
    %c0_i32_0 = arith.constant 0 : i32
    %c0_i32_1 = arith.constant 0 : i32
    return %c0_i32, %c0_i32_0 : i32, i32
  }
  func.func @transform_2(%arg0: i32, %arg1: i32) -> (i32, i32) {
    %c0_i32 = arith.constant 0 : i32
    %c0_i32_0 = arith.constant 0 : i32
    %c0_i32_1 = arith.constant 0 : i32
    return %c0_i32, %c0_i32_0 : i32, i32
  }
  func.func @transform_3(%arg0: i32, %arg1: i32) -> (i32, i32) {
    %c0_i32 = arith.constant 0 : i32
    %c0_i32_0 = arith.constant 0 : i32
    %c0_i32_1 = arith.constant 0 : i32
    return %c0_i32, %c0_i32_0 : i32, i32
  }
  func.func @transform_4(%arg0: i32, %arg1: i32) -> (i32, i32, i32) {
    %c0_i32 = arith.constant 0 : i32
    %c0_i32_0 = arith.constant 0 : i32
    return %arg0, %c0_i32, %arg1 : i32, i32, i32
  }
}

</mosaic_0001>

<bundles_post_ra>
// kernel: tpu_custom_call.1
= control target key start
LH: loop header
LB: loop body
LE: loop exit
PB: predicated region body
PF: predicated region fallthrough
CT: control target
= control target key end

     0   :  { %9 = vsyncpa [#allocation3], 0  ;;  %s983_s0 = inlined_call_operand.hbm [shape: f32[2,8,512], index: 0, kind: input, shape index: {}]   ;;  %s984_s1 = inlined_call_operand.vmem [shape: f32[4,8], index: 1, kind: input, shape index: {}]   ;;  %s985_s2 = inlined_call_operand.vmem [shape: f32[4,4], index: 2, kind: input, shape index: {}]   ;;  %s986_s3 = inlined_call_operand.vmem [shape: f32[6,4], index: 3, kind: input, shape index: {}]   ;;  %s987_s4 = inlined_call_operand.vmem [shape: f32[2,6,512], index: 4, kind: output, shape index: {}]  }
   0x1   :  { %11 = vsyncpa [#allocation3 + $0x1], 0  ;;  %s817_s15 = smov 0   ;;  %s819_s16 = smov 0  }
   0x2   :  { %s821_s17 = smov 0   ;;  %s823_s18 = smov 0  }
   0x3   :  { %s825_s19 = smov 0   ;;  %s827_s20 = smov 0  }
   0x4   :  { %s829_s21 = smov 0   ;;  %s831_s22 = smov 0  }
   0x5 LB: > { %s598_s23 = sadd.s32 4294967295, %s788_s22   ;;  %s26_s24 = sadd.s32 1, %s780_s20  ;;  %s788_s22 = sphi %s831_s22, %s17_s22   ;;  %s784_s21 = sphi %s829_s21, %s1002_s21   ;;  %s780_s20 = sphi %s827_s20, %s1001_s20   ;;  %s776_s19 = sphi %s825_s19, %s1000_s19   ;;  %s772_s18 = sphi %s823_s18, %s999_s18   ;;  %s768_s17 = sphi %s821_s17, %s998_s17   ;;  %s764_s16 = sphi %s819_s16, %s997_s16   ;;  %s760_s15 = sphi %s817_s15, %s996_s15  }
   0x6   : > { %p27_p0 = scmp.ge.s32.totalorder %s26_s24, 2  ;;  %s29_s25 = sadd.s32 1, %s784_s21 }
   0x7   : > { %s38_s26 = sadd.s32 1, %s768_s17  ;;  %p45_p1 = scmp.ne.s32.totalorder %s768_s17, %s764_s16 }
   0x8   : > { %s1004_s24 = smov (%p27_p0, %s26_s24), 0  ;;  %s1006_s25 = smov (!%p27_p0, %s29_s25), %s784_s21 }
   0x9   : > { %s34_s27 = ssub.s32 %s780_s20, %s1004_s24  ;;  %p46_p2 = scmp.eq.s32.totalorder %s788_s22, 0 }
   0xa   : > { %p31_p3 = scmp.ge.s32.totalorder %s1006_s25, 2  ;;  %p51_p4 = scmp.ne.s32.totalorder %s764_s16, %s760_s15 }
   0xb   : > { %p868_p5 = por %p46_p2, %p45_p1  ;;  %p52_p6 = scmp.eq.s32.totalorder %s598_s23, 0 }
   0xc   : > { %s1008_s25 = smov (%p31_p3, %s1006_s25), 0  ;;  %p626_p8 = scmp.lt.s32.totalorder %s788_s22, 4 }
   0xd   : > { %990 = sst [smem:[#allocation5_spill]] %s1008_s25  ;;  %p874_p7 = por %p52_p6, %p51_p4 }
   0xe   : > { %s33_s30 = ssub.s32 %s784_s21, %s1008_s25  ;;  %s175_s6 = sand.u32 1, %s768_s17  }
   0xf   : > { %s35_s5 = sor.u32 %s34_s27, %s33_s30  ;;  %s602_s7 = sshll.u32 %s175_s6, 4 }
  0x10   : > { %p36_p9 = scmp.eq.s32.totalorder %s35_s5, 0  ;;  %s603_s8 = sshll.u32 %s780_s20, 1 }
  0x11   : > { %s604_s10 = sshll.u32 %s784_s21, 2  ;;  %s179_s12 = scalar_lea.vmem [#allocation2], %s602_s7 }
  0x12   : > { %s884_s9 = scalar_select %p36_p9, %s768_s17, %s38_s26  }
  0x13   : > { %s185_s11 = sadd.s32 %s604_s10, %s603_s8  ;;  %s189_s13 = sshll.u32 %s179_s12, 4  ;;  %s887_s13 = int_to_ptr.vmem [resolvable:$true] %s189_s13 }
  0x14   : > { %s605_s14 = sshll.u32 %s185_s11, 7  ;;  %p898_p10 = pnand %p626_p8, %p868_p5 }
  0x15   : > { %s892_s25 = scalar_lea.hbm %s983_s0, %s605_s14  ;;  %s176_s27 = scalar_lea.sflag [#allocation3], %s175_s6 }
  0x16   : > { %s692_s30 = scalar_lea.hbm %s892_s25, 256  ;;  %p694_p0 = pneg %p898_p10 }
  0x17   : > { %p693_p13 = scmp.ne.s32.totalorder %s892_s25, %s692_s30  ;;  %s697_s7 = scalar_lea.hbm %s983_s0, 1024 }
  0x18   : > { %p698_p3 = scmp.lt.u32.totalorder %s892_s25, %s983_s0  ;;  %p699_p4 = scmp.lt.u32.totalorder %s697_s7, %s692_s30 }
  0x19   : > { %p695_p1 = pnand %p694_p0, %p693_p13  ;;  %p701_p6 = scmp.lt.u32.totalorder %s692_s30, %s892_s25 }
  0x1a   : > { %p700_p5 = por %p699_p4, %p698_p3 }
  0x1b   : > { %p696_p2 = pneg %p695_p1 }
  0x1c   : > { %p702_p8 = por %p701_p6, %p700_p5 }
  0x1e   : > { %p703_p9 = pnand %p702_p8, %p696_p2 }
  0x20   : > { %706 = shalt.err (!%p703_p9)
}
  0x21   : > { %s707_s6 = scalar_lea.vmem %s887_s13, 256  ;;  %s790_s11 = smov [#allocation2]  }
  0x22   : > { %p708_p13 = scmp.ne.s32.totalorder %s887_s13, %s707_s6  ;;  %s712_s12 = sshll.u32 %s790_s11, 4  ;;  %s713_s12 = int_to_ptr.vmem [resolvable:$false] %s712_s12 }
  0x23   : > { %s714_s14 = scalar_lea.vmem %s713_s12, 512  ;;  %p715_p12 = scmp.lt.s32.totalorder %s887_s13, %s713_s12 }
  0x24   : > { %p710_p1 = pnand %p708_p13, %p694_p0  ;;  %p716_p3 = scmp.lt.s32.totalorder %s714_s14, %s707_s6 }
  0x26   : > { %p711_p11 = pneg %p710_p1  ;;  %p717_p4 = por %p716_p3, %p715_p12 }
  0x28   : > { %p718_p5 = pnand %p717_p4, %p711_p11 }
  0x2a   : > { %721 = shalt.err (!%p718_p5)
}
  0x2b   : > { %625 = dma.hbm_to_vmem [thread:$0]  (!%p898_p10), %s892_s25, 256, %s887_s13, %s176_s27  }
  0x2c   : > { %p993_p2 = scmp.lt.s32.totalorder %s788_s22, 5  ;;  %p994_p6 = scmp.ge.s32.totalorder %s788_s22, 1 }
  0x2e   : > { %p195_p0 = pnand %p994_p6, %p993_p2 }
  0x2f   : > { %s200_s15 = sand.u32 (!%p195_p0), 1, %s764_s16  }
  0x30   : > { %198 = sbr.rel (%p195_p0) target bundleno = 710 (0x2c6), region = 36  ;;  %s607_s23 = sshll.u32 (!%p195_p0), %s200_s15, 4 }
  0x31   : > { %s201_s30 = scalar_lea.sflag (!%p195_p0), [#allocation3], %s200_s15  ;;  %s204_s28 = scalar_lea.vmem (!%p195_p0), [#allocation2], %s607_s23 }
  0x37   : > { %755 = dma.done.wait (%p874_p7), %s201_s30, 256  }
  0x38   : > { %757 = vsyncadd (%p874_p7), %s201_s30, 4294967040  ;;  %v791_v0 = vmov 0.0   ;;  %v245_v1 = vld [vmem:[%s204_s28 + $0x8] sm:$0xff]  ;;  %v244_v2 = vld [vmem:[%s204_s28] sm:$0xff]  ;;  %vm247_vm0 = vcmask 64512   ;;  %vm333_vm3 = vcmask 1043456  }
  0x39   : > { %315 = vmatprep.mubr.f32.mxu0 %v791_v0  ;;  %404 = vmatprep.mubr.f32.mxu1 %v791_v0  ;;  %v246_v3 = vld [vmem:[%s984_s1] sm:$0xf]  ;;  %vm329_vm4 = vcmask 31744   ;;  %s608_s7 = sshll.u32 %s772_s18, 1  ;;  %p235_p7 = scmp.lt.s32.totalorder %s776_s19, 1 }
  0x3a   : > { %251 = vmatprep.subr.mxu0 %v245_v1  ;;  %v328_v9 = vld [vmem:[%s985_s2] sm:$0xf]  ;;  %p237_p10 = scmp.lt.s32.totalorder %s608_s7, 3 }
  0x3b   : > { %252 = vmatpush1.msra.mxu0 %v244_v2  ;;  %v417_v16 = vld [vmem:[%s986_s3] sm:$0x3f]  ;;  %s1010_s19 = smov (!%p235_p7, %s776_s19), 1 }
  0x3c   : > { %611 = vmatmul.mubr.msk.f32.vlgmr.msra.gmra.mrb[0].mxu0 %vm247_vm0, %v246_v3  ;;  %s1012_s7 = smov (!%p237_p10, %s608_s7), 3  ;;  %s609_s8 = sshll.u32 %s1010_s19, 2 }
  0x3d   : > { %491 = vmatprep.mubr.f32.mxu0 %v791_v0  ;;  %s240_s10 = sadd.s32 %s609_s8, %s1012_s7 }
  0x3e   : > { %s610_s6 = sshll.u32 %s240_s10, 3 }
  0x3f   : > { %s242_s14 = scalar_lea.vmem %s987_s4, %s610_s6 }
 0x10f   : > { %v317_v4 = vpop.f32.mrb[0].mxu0 }
 0x110   : > { %v324_v5 = vmul.f32 0.25, %v317_v4  ;;  %v319_v6 = vpop.f32.mrb[1].mxu0  ;;  %vm322_vm1 = vcmp.ge.f32.partialorder %v317_v4, 0.0 }
 0x111   : > { %v325_v7 = vmul.f32 0.25, %v319_v6  ;;  %vm323_vm2 = vcmp.ge.f32.partialorder %v319_v6, 0.0 }
 0x112   : > { %v326_v10 = vsel %vm322_vm1, %v317_v4, %v324_v5 }
 0x113   : > { %v327_v8 = vsel %vm323_vm2, %v319_v6, %v325_v7 }
 0x114   : > { %612 = vmatprep.subr.msk.mxu1 %vm333_vm3, %v327_v8 }
 0x115   : > { %613 = vmatpush1.msk.msra.mxu1 %vm333_vm3, %v326_v10 }
 0x116   : > { %614 = vmatmul.mubr.msk.f32.vlgmr.msra.gmra.mrb[0].mxu1 %vm329_vm4, %v328_v9 }
 0x1e9   : > { %v406_v11 = vpop.f32.mrb[0].mxu1 }
 0x1ea   : > { %v413_v12 = vmul.f32 0.25, %v406_v11  ;;  %v408_v13 = vpop.f32.mrb[1].mxu1  ;;  %vm411_vm5 = vcmp.ge.f32.partialorder %v406_v11, 0.0 }
 0x1eb   : > { %vm412_vm6 = vcmp.ge.f32.partialorder %v408_v13, 0.0  ;;  %v414_v14 = vmul.f32 0.25, %v408_v13 }
 0x1ec   : > { %v415_v17 = vsel %vm411_vm5, %v406_v11, %v413_v12 }
 0x1ed   : > { %v416_v15 = vsel %vm412_vm6, %v408_v13, %v414_v14 }
 0x1ee   : > { %615 = vmatprep.subr.msk.mxu0 %vm333_vm3, %v416_v15 }
 0x1ef   : > { %616 = vmatpush1.msk.msra.mxu0 %vm333_vm3, %v415_v17 }
 0x1f0   : > { %617 = vmatmul.mubr.msk.f32.vlgmr.msra.gmra.mrb[2].mxu0 %vm329_vm4, %v417_v16 }
 0x2c3   : > { %v493_v18 = vpop.f32.mrb[2].mxu0 }
 0x2c4   : > { %498 = vst [vmem:[%s242_s14] sm:$0x3f] %v493_v18  ;;  %v495_v19 = vpop.f32.mrb[3].mxu0 }
 0x2c5   : > { %499 = vst [vmem:[%s242_s14 + $0x8] sm:$0x3f] %v495_v19 }
 0x2c6 PF: > { %s17_s22 = sadd.s32 1, %s788_s22   ;;  %s995_s23 = sld [smem:[#allocation5_spill]] }
 0x2c7   : > { %p14_p11 = scmp.ge.s32.totalorder %s17_s22, 6   ;;  %s996_s15 = smov %s764_s16 }
 0x2c8   : > { %s997_s16 = smov %s768_s17  ;;  %s998_s17 = smov %s884_s9 }
 0x2c9   : > { %s999_s18 = smov %s780_s20  ;;  %s1000_s19 = smov %s784_s21 }
 0x2ca   : > { %s1001_s20 = smov %s1004_s24  ;;  %16 = sbr.rel (!%p14_p11) target bundleno = 5 (0x5), region = 76 }
 0x2cc   : > { %s1002_s21 = smov %s995_s23 }
 0x2d1   :  { %530 = vsyncpa [#allocation3], 1 }
 0x2d2   :  { %532 = vsyncpa [#allocation3 + $0x1], 1 }

</bundles_post_ra>
